<compile_context>
chip_gen: v7x
topology: tpu7x:2x2x1
jax: 0.10.0
libtpu: 0.0.40
codegen_flags: <defaults>
</compile_context>

<pallas_src>
import math
from functools import partial

import jax
import jax.numpy as jnp
from jax.experimental import pallas as pl
from jax.experimental.pallas import tpu as pltpu

SQRT_HALF = math.sqrt(0.5)


# ----------------------------------------------------------------------------- VMEM plan
def _vmem_capacity_bytes():
    try:
        return int(pltpu.get_tpu_info().vmem_capacity_bytes)
    except Exception:
        return 64 * 1024 * 1024        # conservative (v7x-sized) fallback


def _vmem_plan(capacity):
    # Scoped limit ~60% of physical VMEM, capped at 96 MiB:
    #   v7x (64 MiB)      -> ~38 MiB limit
    #   v5e/v6e (128 MiB) -> ~77 MiB limit
    limit = min((capacity * 3) // 5, 96 * 1024 * 1024)
    budget = limit // 2                # headroom for Mosaic scratch / spills
    return limit, budget


def _vmem_estimate(tile_t, C, E, S, cbytes, attn_bytes):
    f32 = 4
    per_tile = 2 * tile_t * (2 * C * f32 + E * f32 + S * attn_bytes)  # x, out, we, attn (x2 buffers)
    per_batch = 2 * 2 * E * S * cbytes                                # y + yT (x2 buffers)
    weights = 2 * C * E * cbytes + (E + C) * f32                      # single-buffered
    live = 3 * tile_t * (E + S + C) * f32                             # p / scores / ctx working set
    return per_tile + per_batch + weights + live


def _choose_tile_t(T, C, E, S, cbytes, attn_bytes, budget, use_bf16):
    # Full T is best (fewest grid steps) whenever it honors the VMEM budget.
    if _vmem_estimate(T, C, E, S, cbytes, attn_bytes) <= budget:
        return T
    cands = [512, 256, 128, 64, 32, 16]
    if not use_bf16:
        cands.append(8)                # 8-row tiles only make sense for 32-bit operands
    cands = [t for t in cands if t < T]
    for t in cands:                    # descending: biggest tile that fits the budget
        if _vmem_estimate(t, C, E, S, cbytes, attn_bytes) <= budget:
            return t
    return cands[-1] if cands else T


def _single_buffered_spec(block_shape, index_map):
    # Invariant operand: its block index never changes, so double buffering only
    # doubles its VMEM footprint. Fall back silently if pipeline_mode is unavailable.
    try:
        return pl.BlockSpec(block_shape, index_map, pipeline_mode=pl.Buffered(1))
    except Exception:
        return pl.BlockSpec(block_shape, index_map)


# ----------------------------------------------------------------------------- kernel
def _attention_kernel(x_ref, we_ref, y_ref, yt_ref, win_ref, bin_ref, wout_ref,
                      bout_ref, out_ref, attn_ref, *, approx_recip):
    x = x_ref[0]            # (TILE_T, C) f32 (also the residual)
    we = we_ref[0]          # (TILE_T, E) f32
    y = y_ref[0]            # (E, S)  compute dtype
    yt = yt_ref[0]          # (S, E)  compute dtype (pre-transposed in the wrapper)
    w_in = win_ref[...]     # (C, E)  compute dtype (pre-transposed)
    b_in = bin_ref[...]     # (1, E)  f32
    w_out = wout_ref[...]   # (E, C)  compute dtype, pre-scaled by sqrt(S)*sqrt(0.5)
    b_out = bout_ref[...]   # (1, C)  f32, pre-scaled by sqrt(0.5)

    cdt = w_in.dtype        # MXU operand dtype (bf16 fast / f32 exact)

    # p = (in_projection(x) + wordemb) * sqrt(0.5)                   -> (TILE_T, E) f32
    p = (jnp.dot(x.astype(cdt), w_in, preferred_element_type=jnp.float32)
         + b_in + we) * SQRT_HALF

    # scores = p @ y                                                 -> (TILE_T, S) f32
    scores = jnp.dot(p.astype(cdt), y, preferred_element_type=jnp.float32)

    # Row-wise max-stabilized softmax.
    m = jnp.max(scores, axis=-1, keepdims=True)
    e = jnp.exp(scores - m)
    denom = jnp.sum(e, axis=-1, keepdims=True)
    if approx_recip:
        attn = e * pl.reciprocal(denom, approx=True)   # EUP slot, overlaps VALU work
    else:
        attn = e / denom

    # ctx = attn @ y^T — MXU-native thanks to the pre-transposed yT operand.
    ctx = jnp.dot(attn.astype(cdt), yt, preferred_element_type=jnp.float32)  # (TILE_T, E)

    # out = (out_projection(ctx * sqrt(S)) + residual) * sqrt(0.5)
    #     =  ctx @ (w_out.T * sqrt(S)*sqrt(0.5)) + b_out*sqrt(0.5) + x*sqrt(0.5)
    out = (jnp.dot(ctx.astype(cdt), w_out, preferred_element_type=jnp.float32)
           + b_out + x * SQRT_HALF)                                          # (TILE_T, C)

    out_ref[0] = out.astype(out_ref.dtype)
    attn_ref[0] = attn.astype(attn_ref.dtype)


# ----------------------------------------------------------------------------- wrapper
def attention_layer(x, wordemb, imgsfeats, w_in, b_in, w_out, b_out,
                    *, use_bf16=True, approx_softmax=None, tile_t=None):
    """Pallas implementation of AttentionLayer.forward.

    x: (B,T,C) f32, wordemb: (B,T,E) f32, imgsfeats: (B,E,H,W) f32,
    w_in: (E,C), b_in: (E,), w_out: (C,E), b_out: (C,)
    returns (out (B,T,C), attn_scores (B,T,S)) with S = H*W.
    """
    B, T, C = x.shape
    E = wordemb.shape[-1]
    Bi, Ec, H, W = imgsfeats.shape
    assert Ec == E and Bi == B
    S = H * W

    if approx_softmax is None:
        approx_softmax = use_bf16           # decoupled flag (see review)
    cdt = jnp.bfloat16 if use_bf16 else jnp.float32
    attn_dtype = jnp.bfloat16 if use_bf16 else jnp.float32
    cbytes = jnp.dtype(cdt).itemsize
    attn_bytes = jnp.dtype(attn_dtype).itemsize

    # --- layout glue: NO activation padding (kernel uses exact, full-extent dims) ----
    # NCHW -> (B, E, S) is a free view of contiguous data.
    y = imgsfeats.reshape(B, E, S).astype(cdt)
    # Pre-transposed copy: one extra HBM pass per call (amortized over all T tiles of
    # the batch) instead of a per-tile XLU transpose inside the kernel.
    yT = jnp.swapaxes(y, 1, 2)                                        # (B, S, E)

    # Parameter prep (tiny; in a real model these are prepared once at load time).
    # Pre-transpose so the kernel never transposes; fold the constant scales
    # sqrt(S)*sqrt(0.5) / sqrt(0.5) into the out-projection weight / bias.
    w_in_t = w_in.T.astype(cdt)                                       # (C, E)
    b_in_r = b_in.reshape(1, E).astype(jnp.float32)
    w_out_t = (w_out.T * (math.sqrt(S) * SQRT_HALF)).astype(cdt)      # (E, C)
    b_out_r = (b_out * SQRT_HALF).reshape(1, C).astype(jnp.float32)

    vmem_limit, vmem_budget = _vmem_plan(_vmem_capacity_bytes())
    if tile_t is None:
        tile_t = _choose_tile_t(T, C, E, S, cbytes, attn_bytes, vmem_budget, use_bf16)
    nt = pl.cdiv(T, tile_t)     # partial last tile handled by Pallas boundary masking

    out_shapes = (
        jax.ShapeDtypeStruct((B, T, C), x.dtype),      # exact shape: no post-call slice
        jax.ShapeDtypeStruct((B, T, S), attn_dtype),   # bf16 in fast mode (dominant stream)
    )

    grid_spec = pltpu.PrefetchScalarGridSpec(
        num_scalar_prefetch=0,
        grid=(B, nt),
        in_specs=[
            pl.BlockSpec((1, tile_t, C), lambda b, t: (b, t, 0)),     # x (+ residual)
            pl.BlockSpec((1, tile_t, E), lambda b, t: (b, t, 0)),     # wordemb
            pl.BlockSpec((1, E, S), lambda b, t: (b, 0, 0)),          # y  (resident per batch)
            pl.BlockSpec((1, S, E), lambda b, t: (b, 0, 0)),          # yT (resident per batch)
            _single_buffered_spec((C, E), lambda b, t: (0, 0)),       # w_in^T
            _single_buffered_spec((1, E), lambda b, t: (0, 0)),       # b_in
            _single_buffered_spec((E, C), lambda b, t: (0, 0)),       # w_out^T (pre-scaled)
            _single_buffered_spec((1, C), lambda b, t: (0, 0)),       # b_out   (pre-scaled)
        ],
        out_specs=[
            pl.BlockSpec((1, tile_t, C), lambda b, t: (b, t, 0)),
            pl.BlockSpec((1, tile_t, S), lambda b, t: (b, t, 0)),
        ],
    )

    kernel = partial(_attention_kernel, approx_recip=bool(approx_softmax))

    out, attn = pl.pallas_call(
        kernel,
        out_shape=out_shapes,
        grid_spec=grid_spec,
        compiler_params=pltpu.CompilerParams(
            dimension_semantics=("parallel", "parallel"),
            vmem_limit_bytes=int(vmem_limit),
        ),
    )(x, wordemb, y, yT, w_in_t, b_in_r, w_out_t, b_out_r)

    return out, attn


# ----------------------------------------------------------------------------- reference
def attention_layer_ref(x, wordemb, imgsfeats, w_in, b_in, w_out, b_out):
    """Pure-JAX reference mirroring the PyTorch forward."""
    b, c, fh, fw = imgsfeats.shape
    residual = x
    p = (x @ w_in.T + b_in + wordemb) * math.sqrt(0.5)
    y = imgsfeats.reshape(b, c, fh * fw)
    scores = jnp.einsum("bte,bes->bts", p, y)
    attn = jax.nn.softmax(scores, axis=-1)
    yT = jnp.transpose(y, (0, 2, 1))
    ctx = jnp.einsum("bts,bse->bte", attn, yT)
    s = yT.shape[1]
    ctx = ctx * (s * math.sqrt(1.0 / s))
    out = (ctx @ w_out.T + b_out + residual) * math.sqrt(0.5)
    return out, attn


if __name__ == "__main__":
    # Small shapes consistent with the module.
    B, T = 2, 8                 # batch, sequence length
    C = 4                       # conv_channels
    E = 32                      # embed_dim
    H = W = 4                   # image feature map -> S = 16

    key = jax.random.PRNGKey(0)
    k_x, k_we, k_img, k_win, k_wout = jax.random.split(key, 5)

    x = jax.random.normal(k_x, (B, T, C), dtype=jnp.float32)
    wordemb = jax.random.normal(k_we, (B, T, E), dtype=jnp.float32)
    imgsfeats = jax.random.normal(k_img, (B, E, H, W), dtype=jnp.float32)

    # Parameter init matching the PyTorch Linear() helper:
    #   weight ~ N(0, sqrt((1 - dropout)/in_features)), bias = 0.
    # weight_norm at init sets g = ||v|| row-wise, so the effective weight equals v.
    w_in = jax.random.normal(k_win, (E, C), dtype=jnp.float32) * math.sqrt(1.0 / C)
    b_in = jnp.zeros((E,), dtype=jnp.float32)
    w_out = jax.random.normal(k_wout, (C, E), dtype=jnp.float32) * math.sqrt(1.0 / E)
    b_out = jnp.zeros((C,), dtype=jnp.float32)

    out_exp, attn_exp = attention_layer_ref(x, wordemb, imgsfeats, w_in, b_in, w_out, b_out)

    # 1) Exactness check: f32 MXU operands + exact divide + f32 attn output.
    out32, attn32 = attention_layer(x, wordemb, imgsfeats, w_in, b_in, w_out, b_out,
                                    use_bf16=False)
    out32 = jax.block_until_ready(out32)
    attn32 = jax.block_until_ready(attn32)
    assert jnp.allclose(out32, out_exp, atol=1e-4, rtol=1e-4)
    assert jnp.allclose(attn32, attn_exp, atol=1e-4, rtol=1e-4)

    # 2) Performance configuration: bf16 MXU operands (f32 accumulation), approx EUP
    #    reciprocal, bf16 attn writeback. Tolerances loosened for bf16 rounding.
    out_bf, attn_bf = attention_layer(x, wordemb, imgsfeats, w_in, b_in, w_out, b_out,
                                      use_bf16=True)
    out_bf = jax.block_until_ready(out_bf)
    attn_bf = jax.block_until_ready(attn_bf)
    assert jnp.allclose(attn_bf.astype(jnp.float32), attn_exp, atol=3e-2, rtol=3e-2)
    assert jnp.allclose(out_bf, out_exp, atol=1e-1, rtol=1e-1)

    print("KERNEL_OK")
</pallas_src>

<mosaic_0001>
module attributes {stable_mosaic.version = 11 : i64} {
  func.func @_attention_kernel(%arg0: i32, %arg1: i32, %arg2: memref<1x8x4xf32, #tpu.memory_space<vmem>>, %arg3: memref<1x8x32xf32, #tpu.memory_space<vmem>>, %arg4: memref<1x32x16xf32, #tpu.memory_space<vmem>>, %arg5: memref<1x16x32xf32, #tpu.memory_space<vmem>>, %arg6: memref<4x32xf32, #tpu.memory_space<vmem>>, %arg7: memref<1x32xf32, #tpu.memory_space<vmem>>, %arg8: memref<32x4xf32, #tpu.memory_space<vmem>>, %arg9: memref<1x4xf32, #tpu.memory_space<vmem>>, %arg10: memref<1x8x4xf32, #tpu.memory_space<vmem>>, %arg11: memref<1x8x16xf32, #tpu.memory_space<vmem>>) attributes {dimension_semantics = [#tpu.dimension_semantics<parallel>, #tpu.dimension_semantics<parallel>], iteration_bounds = array<i64: 2, 1>, scalar_prefetch = 0 : i64, scratch_operands = 0 : i64, tpu.core_type = #tpu.core_type<tc>, window_params = [{transform_indices = @transform_0, window_bounds = array<i64: 1, 8, 4>}, {transform_indices = @transform_1, window_bounds = array<i64: 1, 8, 32>}, {transform_indices = @transform_2, window_bounds = array<i64: 1, 32, 16>}, {transform_indices = @transform_3, window_bounds = array<i64: 1, 16, 32>}, {pipeline_mode = #tpu.pipeline_mode<synchronous>, transform_indices = @transform_4, window_bounds = array<i64: 4, 32>}, {pipeline_mode = #tpu.pipeline_mode<synchronous>, transform_indices = @transform_5, window_bounds = array<i64: 1, 32>}, {pipeline_mode = #tpu.pipeline_mode<synchronous>, transform_indices = @transform_6, window_bounds = array<i64: 32, 4>}, {pipeline_mode = #tpu.pipeline_mode<synchronous>, transform_indices = @transform_7, window_bounds = array<i64: 1, 4>}, {transform_indices = @transform_8, window_bounds = array<i64: 1, 8, 4>}, {transform_indices = @transform_9, window_bounds = array<i64: 1, 8, 16>}]} {
    %c0 = arith.constant 0 : index
    %c0_0 = arith.constant 0 : index
    %c0_1 = arith.constant 0 : index
    %0 = vector.load %arg2[%c0, %c0_0, %c0_1] : memref<1x8x4xf32, #tpu.memory_space<vmem>>, vector<1x8x4xf32>
    %1 = vector.shape_cast %0 : vector<1x8x4xf32> to vector<8x4xf32>
    %c0_2 = arith.constant 0 : index
    %c0_3 = arith.constant 0 : index
    %c0_4 = arith.constant 0 : index
    %2 = vector.load %arg3[%c0_2, %c0_3, %c0_4] : memref<1x8x32xf32, #tpu.memory_space<vmem>>, vector<1x8x32xf32>
    %3 = vector.shape_cast %2 : vector<1x8x32xf32> to vector<8x32xf32>
    %c0_5 = arith.constant 0 : index
    %c0_6 = arith.constant 0 : index
    %c0_7 = arith.constant 0 : index
    %4 = vector.load %arg4[%c0_5, %c0_6, %c0_7] : memref<1x32x16xf32, #tpu.memory_space<vmem>>, vector<1x32x16xf32>
    %5 = vector.shape_cast %4 : vector<1x32x16xf32> to vector<32x16xf32>
    %c0_8 = arith.constant 0 : index
    %c0_9 = arith.constant 0 : index
    %c0_10 = arith.constant 0 : index
    %6 = vector.load %arg5[%c0_8, %c0_9, %c0_10] : memref<1x16x32xf32, #tpu.memory_space<vmem>>, vector<1x16x32xf32>
    %7 = vector.shape_cast %6 : vector<1x16x32xf32> to vector<16x32xf32>
    %c0_11 = arith.constant 0 : index
    %c0_12 = arith.constant 0 : index
    %8 = vector.load %arg6[%c0_11, %c0_12] : memref<4x32xf32, #tpu.memory_space<vmem>>, vector<4x32xf32>
    %c0_13 = arith.constant 0 : index
    %c0_14 = arith.constant 0 : index
    %9 = vector.load %arg7[%c0_13, %c0_14] : memref<1x32xf32, #tpu.memory_space<vmem>>, vector<1x32xf32>
    %c0_15 = arith.constant 0 : index
    %c0_16 = arith.constant 0 : index
    %10 = vector.load %arg8[%c0_15, %c0_16] : memref<32x4xf32, #tpu.memory_space<vmem>>, vector<32x4xf32>
    %c0_17 = arith.constant 0 : index
    %c0_18 = arith.constant 0 : index
    %11 = vector.load %arg9[%c0_17, %c0_18] : memref<1x4xf32, #tpu.memory_space<vmem>>, vector<1x4xf32>
    %cst = arith.constant dense<0.000000e+00> : vector<8x32xf32>
    %12 = tpu.matmul %1, %8, %cst {dimension_numbers = #tpu.dot_dimension_numbers<[1], [0], [0], [1], [0, 0, 1, 1], [], []>} : vector<8x4xf32>, vector<4x32xf32>, vector<8x32xf32> -> vector<8x32xf32>
    %13 = vector.broadcast %9 : vector<1x32xf32> to vector<8x32xf32>
    %14 = arith.addf %12, %13 : vector<8x32xf32>
    %15 = arith.addf %14, %3 : vector<8x32xf32>
    %cst_19 = arith.constant 0.707106769 : f32
    %16 = vector.broadcast %cst_19 : f32 to vector<8x32xf32>
    %17 = arith.mulf %15, %16 : vector<8x32xf32>
    %cst_20 = arith.constant dense<0.000000e+00> : vector<8x16xf32>
    %18 = tpu.matmul %17, %5, %cst_20 {dimension_numbers = #tpu.dot_dimension_numbers<[1], [0], [0], [1], [0, 0, 1, 1], [], []>} : vector<8x32xf32>, vector<32x16xf32>, vector<8x16xf32> -> vector<8x16xf32>
    %cst_21 = arith.constant dense<0xFF800000> : vector<8xf32>
    %19 = vector.multi_reduction <maximumf>, %18, %cst_21 [1] : vector<8x16xf32> to vector<8xf32>
    %20 = vector.shape_cast %19 : vector<8xf32> to vector<8x1xf32>
    %21 = vector.broadcast %20 : vector<8x1xf32> to vector<8x16xf32>
    %22 = arith.subf %18, %21 : vector<8x16xf32>
    %23 = math.exp %22 : vector<8x16xf32>
    %cst_22 = arith.constant dense<0.000000e+00> : vector<8xf32>
    %24 = vector.multi_reduction <add>, %23, %cst_22 [1] : vector<8x16xf32> to vector<8xf32>
    %25 = vector.shape_cast %24 : vector<8xf32> to vector<8x1xf32>
    %26 = vector.broadcast %25 : vector<8x1xf32> to vector<8x16xf32>
    %27 = arith.divf %23, %26 : vector<8x16xf32>
    %cst_23 = arith.constant dense<0.000000e+00> : vector<8x32xf32>
    %28 = tpu.matmul %27, %7, %cst_23 {dimension_numbers = #tpu.dot_dimension_numbers<[1], [0], [0], [1], [0, 0, 1, 1], [], []>} : vector<8x16xf32>, vector<16x32xf32>, vector<8x32xf32> -> vector<8x32xf32>
    %cst_24 = arith.constant dense<0.000000e+00> : vector<8x4xf32>
    %29 = tpu.matmul %28, %10, %cst_24 {dimension_numbers = #tpu.dot_dimension_numbers<[1], [0], [0], [1], [0, 0, 1, 1], [], []>} : vector<8x32xf32>, vector<32x4xf32>, vector<8x4xf32> -> vector<8x4xf32>
    %30 = vector.broadcast %11 : vector<1x4xf32> to vector<8x4xf32>
    %31 = arith.addf %29, %30 : vector<8x4xf32>
    %cst_25 = arith.constant 0.707106769 : f32
    %32 = vector.broadcast %cst_25 : f32 to vector<8x4xf32>
    %33 = arith.mulf %1, %32 : vector<8x4xf32>
    %34 = arith.addf %31, %33 : vector<8x4xf32>
    %c0_26 = arith.constant 0 : index
    %c0_27 = arith.constant 0 : index
    %c0_28 = arith.constant 0 : index
    %35 = vector.load %arg10[%c0_26, %c0_27, %c0_28] : memref<1x8x4xf32, #tpu.memory_space<vmem>>, vector<1x8x4xf32>
    %36 = vector.shape_cast %35 : vector<1x8x4xf32> to vector<8x4xf32>
    %37 = vector.shape_cast %34 : vector<8x4xf32> to vector<1x8x4xf32>
    tpu.vector_store %arg10[%c0_26, %c0_27, %c0_28], %37 {strides = array<i32>} : memref<1x8x4xf32, #tpu.memory_space<vmem>>, vector<1x8x4xf32>,
    %c0_29 = arith.constant 0 : index
    %c0_30 = arith.constant 0 : index
    %c0_31 = arith.constant 0 : index
    %38 = vector.load %arg11[%c0_29, %c0_30, %c0_31] : memref<1x8x16xf32, #tpu.memory_space<vmem>>, vector<1x8x16xf32>
    %39 = vector.shape_cast %38 : vector<1x8x16xf32> to vector<8x16xf32>
    %40 = vector.shape_cast %27 : vector<8x16xf32> to vector<1x8x16xf32>
    tpu.vector_store %arg11[%c0_29, %c0_30, %c0_31], %40 {strides = array<i32>} : memref<1x8x16xf32, #tpu.memory_space<vmem>>, vector<1x8x16xf32>,
    return
  }
  func.func @transform_0(%arg0: i32, %arg1: i32) -> (i32, i32, i32) {
    %c0_i32 = arith.constant 0 : i32
    %c0_i32_0 = arith.constant 0 : i32
    return %arg0, %arg1, %c0_i32 : i32, i32, i32
  }
  func.func @transform_1(%arg0: i32, %arg1: i32) -> (i32, i32, i32) {
    %c0_i32 = arith.constant 0 : i32
    %c0_i32_0 = arith.constant 0 : i32
    return %arg0, %arg1, %c0_i32 : i32, i32, i32
  }
  func.func @transform_2(%arg0: i32, %arg1: i32) -> (i32, i32, i32) {
    %c0_i32 = arith.constant 0 : i32
    %c0_i32_0 = arith.constant 0 : i32
    %c0_i32_1 = arith.constant 0 : i32
    return %arg0, %c0_i32, %c0_i32_0 : i32, i32, i32
  }
  func.func @transform_3(%arg0: i32, %arg1: i32) -> (i32, i32, i32) {
    %c0_i32 = arith.constant 0 : i32
    %c0_i32_0 = arith.constant 0 : i32
    %c0_i32_1 = arith.constant 0 : i32
    return %arg0, %c0_i32, %c0_i32_0 : i32, i32, i32
  }
  func.func @transform_4(%arg0: i32, %arg1: i32) -> (i32, i32) {
    %c0_i32 = arith.constant 0 : i32
    %c0_i32_0 = arith.constant 0 : i32
    %c0_i32_1 = arith.constant 0 : i32
    return %c0_i32, %c0_i32_0 : i32, i32
  }
  func.func @transform_5(%arg0: i32, %arg1: i32) -> (i32, i32) {
    %c0_i32 = arith.constant 0 : i32
    %c0_i32_0 = arith.constant 0 : i32
    %c0_i32_1 = arith.constant 0 : i32
    return %c0_i32, %c0_i32_0 : i32, i32
  }
  func.func @transform_6(%arg0: i32, %arg1: i32) -> (i32, i32) {
    %c0_i32 = arith.constant 0 : i32
    %c0_i32_0 = arith.constant 0 : i32
    %c0_i32_1 = arith.constant 0 : i32
    return %c0_i32, %c0_i32_0 : i32, i32
  }
  func.func @transform_7(%arg0: i32, %arg1: i32) -> (i32, i32) {
    %c0_i32 = arith.constant 0 : i32
    %c0_i32_0 = arith.constant 0 : i32
    %c0_i32_1 = arith.constant 0 : i32
    return %c0_i32, %c0_i32_0 : i32, i32
  }
  func.func @transform_8(%arg0: i32, %arg1: i32) -> (i32, i32, i32) {
    %c0_i32 = arith.constant 0 : i32
    %c0_i32_0 = arith.constant 0 : i32
    return %arg0, %arg1, %c0_i32 : i32, i32, i32
  }
  func.func @transform_9(%arg0: i32, %arg1: i32) -> (i32, i32, i32) {
    %c0_i32 = arith.constant 0 : i32
    %c0_i32_0 = arith.constant 0 : i32
    return %arg0, %arg1, %c0_i32 : i32, i32, i32
  }
}

</mosaic_0001>

<bundles_post_ra>
// kernel: tpu_custom_call.1
= control target key start
LH: loop header
LB: loop body
LE: loop exit
PB: predicated region body
PF: predicated region fallthrough
CT: control target
= control target key end

     0   :  { %s1410_s0 = inlined_call_operand.vmem [shape: f32[2,8,4], index: 0, kind: input, shape index: {}]   ;;  %s1411_s1 = inlined_call_operand.vmem [shape: f32[2,8,32], index: 1, kind: input, shape index: {}]   ;;  %s1412_s2 = inlined_call_operand.vmem [shape: f32[2,32,16], index: 2, kind: input, shape index: {}]   ;;  %s1413_s3 = inlined_call_operand.vmem [shape: f32[2,16,32], index: 3, kind: input, shape index: {}]   ;;  %s1414_s4 = inlined_call_operand.vmem [shape: f32[4,32], index: 4, kind: input, shape index: {}]   ;;  %s1415_s5 = inlined_call_operand.vmem [shape: f32[1,32], index: 5, kind: input, shape index: {}]   ;;  %s1416_s6 = inlined_call_operand.vmem [shape: f32[32,4], index: 6, kind: input, shape index: {}]   ;;  %s1417_s7 = inlined_call_operand.vmem [shape: f32[1,4], index: 7, kind: input, shape index: {}]   ;;  %s1418_s8 = inlined_call_operand.vmem [shape: f32[2,8,4], index: 8, kind: output, shape index: {0}]   ;;  %s1419_s9 = inlined_call_operand.hbm [shape: f32[2,8,16], index: 9, kind: output, shape index: {1}]  }
   0x1   :  { %1420 = sst [smem:[#allocation5_spill]] %s1410_s0 }
   0x2   :  { %1421 = sst [smem:[#allocation6_spill]] %s1411_s1 }
   0x3   :  { %15 = vsyncpa [#allocation3], 0 }
   0x4   :  { %17 = vsyncpa [#allocation3 + $0x1], 0  ;;  %s1235_s30 = smov 0   ;;  %s1237_s10 = smov 0  }
   0x5   :  { %s1239_s11 = smov 0   ;;  %s1241_s12 = smov 0  }
   0x6   :  { %s1243_s13 = smov 0   ;;  %s1245_s14 = smov 0  }
   0x7 LB: > { %s949_s15 = sadd.s32 4294967295, %s1179_s14   ;;  %s950_s16 = sadd.s32 4294967294, %s1179_s14   ;;  %s1179_s14 = sphi %s1245_s14, %s23_s14   ;;  %s1175_s13 = sphi %s1243_s13, %s1430_s13   ;;  %s1171_s12 = sphi %s1241_s12, %s1429_s12   ;;  %s1167_s11 = sphi %s1239_s11, %s1428_s11   ;;  %s1163_s10 = sphi %s1237_s10, %s1427_s10   ;;  %s1159_s30 = sphi %s1235_s30, %s1426_s30  }
   0x8   : > { %s35_s17 = sadd.s32 1, %s1175_s13  ;;  %s264_s18 = sadd.s32 1, %s1167_s11 }
   0x9   : > { %p37_p0 = scmp.ge.s32.totalorder %s35_s17, 2  ;;  %p274_p1 = scmp.ne.s32.totalorder %s1167_s11, %s1163_s10 }
   0xa   : > { %p275_p2 = scmp.eq.s32.totalorder %s949_s15, 1  ;;  %p280_p3 = scmp.ne.s32.totalorder %s1163_s10, %s1159_s30 }
   0xb   : > { %s1432_s17 = smov (%p37_p0, %s35_s17), 0  ;;  %p281_p5 = scmp.eq.s32.totalorder %s950_s16, 1 }
   0xc   : > { %p1275_p4 = por %p275_p2, %p274_p1  ;;  %s259_s20 = ssub.s32 %s1175_s13, %s1432_s17 }
   0xd   : > { %p953_p6 = scmp.ge.s32.totalorder %s1179_s14, 1  ;;  %p262_p7 = scmp.eq.s32.totalorder %s259_s20, 0 }
   0xe   : > { %p1282_p8 = por %p281_p5, %p280_p3  ;;  %p347_p9 = scmp.lt.s32.totalorder %s1179_s14, 3 }
   0xf   : > { %s1288_s22 = scalar_select %p262_p7, %s1167_s11, %s264_s18  }
  0x10   : > { %p348_p10 = pnand %p953_p6, %p347_p9 }
  0x11   : > { %v448_v0 = vld [vmem:[%s1414_s4] sm:$0xf] (!%p348_p10)  ;;  %vm465_vm0 = vcmask (!%p348_p10), 1043456   ;;  %p409_p11 = scmp.lt.s32.totalorder (!%p348_p10), %s1171_s12, 1  ;;  %v1181_v1 = vmov (!%p348_p10), 0.0   ;;  %vm1182_vm1 = vmmov (!%p348_p10), 0  }
  0x12   : > { %351 = sbr.rel (%p348_p10) target bundleno = 1203 (0x4b3), region = 52  ;;  %990 = vmatprep.subr.mxu1 (!%p348_p10), %v1181_v1  ;;  %992 = vmatprep.mubr.msk.f32.mxu1 (!%p348_p10), %vm1182_vm1, %v1181_v1  ;;  %v1183_v2 = vmov (!%p348_p10), 0.0|0.0   ;;  %vm461_vm2 = vcmask (!%p348_p10), 31744   ;;  %s1424_s0 = sld [smem:[#allocation5_spill]] (!%p348_p10)  ;;  %v962_v10 = vld [vmem:[%s1415_s5] ss:$0 sm:$0xff] (!%p348_p10) }
  0x13   : > { %991 = vmatpush3.msk.msra.mxu1 (!%p348_p10), %vm465_vm0, %v448_v0  ;;  %1030 = vmatprep.subr.bf16.mxu0 (!%p348_p10), %v1183_v2  ;;  %s1425_s1 = sld [smem:[#allocation6_spill]] (!%p348_p10)  ;;  %vm541_vm3 = vcmask (!%p348_p10), 261120   ;;  %vm615_vm4 = vcmask (!%p348_p10), 130048   ;;  %s406_s23 = sand.u32 (!%p348_p10), 1, %s1163_s10   ;;  %v450_v29 = vld [vmem:[%s1416_s6] sm:$0xff] (!%p348_p10)  ;;  %v451_v30 = vld [vmem:[%s1416_s6 + $0x8] sm:$0xff] (!%p348_p10) }
  0x14   : > { %1024 = vmatprep.subr.bf16.mxu1 (!%p348_p10), %v1183_v2  ;;  %1010 = vmatprep.mubr.msk.f32.mxu0 (!%p348_p10), %vm1182_vm1, %v1181_v1  ;;  %v1034_v32 = vpack.c.bf16 (!%p348_p10), %v451_v30, %v450_v29  ;;  %v452_v34 = vld [vmem:[%s1416_s6 + $0x10] sm:$0xff] (!%p348_p10)  ;;  %v453_v35 = vld [vmem:[%s1416_s6 + $0x18] sm:$0xff] (!%p348_p10)  ;;  %s791_s16 = scalar_lea.sflag (!%p348_p10), [#allocation3], %s406_s23 }
  0x15   : > { %v1037_v36 = vpack.c.bf16 (!%p348_p10), %v453_v35, %v452_v34 }
  0x19   : > { %s1298_s25 = scalar_select %p409_p11, %s1171_s12, 1 }
  0x1b   : > { %s1305_s26 = sshll.u32 %s1298_s25, 3  ;;  %s973_s15 = sshll.u32 %s1298_s25, 5 }
  0x1c   : > { %s415_s29 = scalar_lea.vmem %s1424_s0, %s1305_s26  ;;  %s427_s20 = scalar_lea.vmem %s1412_s2, %s973_s15 }
  0x1d   : > { %v1311_v3 = vld [vmem:[%s415_s29] sm:$0xff]  ;;  %v443_v5 = vld [vmem:[%s427_s20 + $0x8] sm:$0xff]  ;;  %v444_v7 = vld [vmem:[%s427_s20 + $0x10] sm:$0xff]  ;;  %s422_s27 = scalar_lea.vmem %s1425_s1, %s1305_s26  ;;  %s974_s15 = sshll.u32 %s1298_s25, 4 }
  0x1e   : > { %993 = vmatmul.mubr.msk.f32.vlgmr.msra.gmra.mrb[0].mxu1 %vm461_vm2, %v1311_v3  ;;  %v442_v4 = vld [vmem:[%s427_s20] sm:$0xff]  ;;  %v445_v8 = vld [vmem:[%s427_s20 + $0x18] sm:$0xff]  ;;  %s432_s20 = scalar_lea.vmem %s1413_s3, %s974_s15  ;;  %s954_s25 = sshll.u32 %s406_s23, 3 }
  0x1f   : > { %1003 = vmatprep.mubr.msk.f32.mxu1 %vm1182_vm1, %v1181_v1  ;;  %v1025_v6 = vpack.c.bf16 %v443_v5, %v442_v4  ;;  %v1028_v9 = vpack.c.bf16 %v445_v8, %v444_v7  ;;  %v441_v11 = vld [vmem:[%s422_s27] sm:$0xff]  ;;  %v447_v26 = vld [vmem:[%s432_s20 + $0x8] sm:$0xff]  ;;  %s408_s24 = scalar_lea.vmem [#allocation2], %s954_s25  ;;  %s970_s27 = sshll.u32 %s1171_s12, 7 }
  0x20   : > { %v446_v25 = vld [vmem:[%s432_s20] sm:$0xff]  ;;  %s808_s28 = sshll.u32 %s408_s24, 4  ;;  %s1360_s25 = scalar_lea.hbm %s1419_s9, %s970_s27  ;;  %s809_s28 = int_to_ptr.vmem [resolvable:$true] %s808_s28 }
  0x21   : > { %1026 = vmatpush3.bf16.msra.mxu1 %v1025_v6  ;;  %v1031_v27 = vpack.c.bf16 %v447_v26, %v446_v25  ;;  %s1101_s18 = scalar_lea.vmem %s809_s28, 128  ;;  %s1184_s20 = smov [#allocation2]  }
  0x22   : > { %1027 = vmatprep.subr.bf16.mxu1 %v1183_v2  ;;  %p1102_p12 = scmp.ne.s32.totalorder %s809_s28, %s1101_s18  ;;  %s1105_s0 = sshll.u32 %s1184_s20, 4  ;;  %s1106_s0 = int_to_ptr.vmem [resolvable:$false] %s1105_s0 }
  0x23   : > { %1032 = vmatpush3.bf16.msra.mxu0 %v1031_v27  ;;  %s1107_s1 = scalar_lea.vmem %s1106_s0, 256  ;;  %p1108_p1 = scmp.lt.s32.totalorder %s809_s28, %s1106_s0 }
  0x24   : > { %1033 = vmatprep.subr.bf16.mxu0 %v1183_v2  ;;  %p1103_p13 = pnand %p1102_p12, %p1275_p4  ;;  %p1109_p2 = scmp.lt.s32.totalorder %s1107_s1, %s1101_s18 }
  0x25   : > { %1029 = vmatpush3.bf16.msra.mxu1 %v1028_v9 }
  0x26   : > { %p1104_p0 = pneg %p1103_p13  ;;  %p1110_p3 = por %p1109_p2, %p1108_p1 }
  0x28   : > { %p1111_p5 = pnand %p1110_p3, %p1104_p0 }
  0xf1   : > { %v535_v12 = vpop.f32.mrb[0].mxu1 }
  0xf2   : > { %v536_v13 = vadd.f32 %v962_v10, %v535_v12  ;;  %v994_v14 = vpop.f32.mrb[1].mxu1 }
  0xf4   : > { %v539_v15 = vadd.f32 %v536_v13, %v441_v11 }
  0xf6   : > { %v540_v16 = vmul.f32 0.70710677, %v539_v15 }
  0xf8   : > { %1004 = vmatmul.mubr.msk.f32.vlgmr.msra.gmra.mrb[2].mxu1 %vm541_vm3, %v540_v16 }
 0x1cb   : > { %v611_v17 = vpop.f32.mrb[2].mxu1 }
 0x1cc   : > { %v1005_v18 = vpop.f32.mrb[3].mxu1  ;;  %v616_v19 = vsel %vm615_vm4, %v611_v17, -inf }
 0x1cd   : > { %617 = vmax.xlane.f32.xlu0 %v616_v19 }
 0x25a   : > { %v618_v20 = vpop.xlane.xlu0 %617 }
 0x25b   : > { %v619_v21 = vsub.f32 %v611_v17, %v618_v20 }
 0x25d   : > { %v620_v22 = vmul.f32 1.442695, %v619_v21 }
 0x25f   : > { %1097 = vpow2.f32 %v620_v22 }
 0x269   : > { %v1098_v23 = vpop.eup %1097 }
 0x26a   : > { %v622_v24 = vsel %vm615_vm4, %v1098_v23, 0.0 }
 0x26b   : > { %623 = vadd.xlane.f32.xlu0 %v622_v24 }
 0x2f8   : > { %v624_v28 = vpop.xlane.xlu0 %623 }
 0x2f9   : > { %1099 = vrcp.f32 %v624_v28 }
 0x303   : > { %v1100_v31 = vpop.eup %1099 }
 0x304   : > { %v626_v33 = vmul.f32 %v1100_v31, %v1098_v23 }
 0x306   : > { %1011 = vmatmul.mubr.msk.f32.vlgmr.msra.gmra.mrb[0].mxu0 %vm615_vm4, %v626_v33  ;;  %782 = vst.msk [vmem:[%s408_s24] sm:$0xff] %vm615_vm4, %v626_v33 }
 0x307   : > { %1035 = vmatpush3.bf16.msra.mxu0 %v1034_v32  ;;  %1021 = vmatprep.mubr.msk.f32.mxu0 %vm1182_vm1, %v1181_v1 }
 0x308   : > { %1036 = vmatprep.subr.bf16.mxu0 %v1183_v2 }
 0x30b   : > { %1038 = vmatpush3.bf16.msra.mxu0 %v1037_v36 }
 0x3d9   : > { %v696_v37 = vpop.f32.mrb[0].mxu0 }
 0x3da   : > { %v1012_v38 = vpop.f32.mrb[1].mxu0  ;;  %1022 = vmatmul.mubr.msk.f32.vlgmr.msra.gmra.mrb[2].mxu0 %vm541_vm3, %v696_v37 }
 0x3db   : > { %1114 = shalt.err (!%p1111_p5)
}
 0x3dc   : > { %s1115_s12 = scalar_lea.hbm %s1360_s25, 128  ;;  %s1119_s27 = scalar_lea.hbm %s1419_s9, 256 }
 0x3dd   : > { %p1116_p6 = scmp.ne.s32.totalorder %s1360_s25, %s1115_s12  ;;  %p1120_p10 = scmp.lt.u32.totalorder %s1360_s25, %s1419_s9 }
 0x3de   : > { %p1121_p11 = scmp.lt.u32.totalorder %s1119_s27, %s1115_s12  ;;  %p1123_p13 = scmp.lt.u32.totalorder %s1115_s12, %s1360_s25 }
 0x3df   : > { %p1117_p7 = pnand %p1116_p6, %p1275_p4 }
 0x3e0   : > { %p1122_p12 = por %p1121_p11, %p1120_p10 }
 0x3e1   : > { %p1118_p9 = pneg %p1117_p7 }
 0x3e2   : > { %p1124_p0 = por %p1123_p13, %p1122_p12 }
 0x3e4   : > { %p1125_p1 = pnand %p1124_p0, %p1118_p9 }
 0x3e6   : > { %1128 = shalt.err (!%p1125_p1)
}
 0x3e7   : > { %1039 = dma.vmem_to_hbm [thread:$0]  (%p1275_p4), %s809_s28, 128, %s1360_s25, %s791_s16   ;;  %v967_v39 = vld [vmem:[%s1417_s7] ss:$0 sm:$0xff]  ;;  %v779_v40 = vmul.f32 0.70710677, %v1311_v3 }
 0x3e8   : > { %s439_s12 = scalar_lea.vmem %s1418_s8, %s1305_s26 }
 0x4ad   : > { %v775_v41 = vpop.f32.mrb[2].mxu0 }
 0x4ae   : > { %v776_v42 = vadd.f32 %v967_v39, %v775_v41  ;;  %v1023_v43 = vpop.f32.mrb[3].mxu0 }
 0x4b0   : > { %v780_v44 = vadd.f32 %v779_v40, %v776_v42 }
 0x4b2   : > { %781 = vst.msk [vmem:[%s439_s12] sm:$0xff] %vm461_vm2, %v780_v44 }
 0x4b3 PF: > { %p1045_p4 = scmp.ge.s32.totalorder %s1179_s14, 2  ;;  %s830_s19 = sand.u32 1, %s1159_s30  }
 0x4b4   : > { %s831_s28 = scalar_lea.sflag [#allocation3], %s830_s19 }
 0x4b5   : > { %p1042_p2 = pnand %p1045_p4, %p1282_p8 }
 0x4b7   : > { %1154 = dma.done.wait (!%p1042_p2), %s831_s28, 128  }
 0x4b8   : > { %1156 = vsyncadd (!%p1042_p2), %s831_s28, 4294967168  ;;  %s23_s14 = sadd.s32 1, %s1179_s14   ;;  %s1426_s30 = smov %s1163_s10 }
 0x4b9   : > { %p20_p3 = scmp.ge.s32.totalorder %s23_s14, 4   ;;  %s1427_s10 = smov %s1167_s11 }
 0x4ba   : > { %s1428_s11 = smov %s1288_s22  ;;  %s1429_s12 = smov %s1175_s13 }
 0x4bb   : > { %s1430_s13 = smov %s1432_s17  ;;  %22 = sbr.rel (!%p20_p3) target bundleno = 7 (0x7), region = 108 }
 0x4c2   :  { %836 = vsyncpa [#allocation3], 1 }
 0x4c3   :  { %838 = vsyncpa [#allocation3 + $0x1], 1 }

</bundles_post_ra>
